<compile_context>
chip_gen: v6e
topology: v6e:2x2x1
jax: 0.10.0
libtpu: 0.0.40
codegen_flags: <defaults>
</compile_context>

<pallas_src>
import functools
import math

import jax
import jax.numpy as jnp
import numpy as np
from jax.experimental import pallas as pl
from jax.experimental.pallas import tpu as pltpu


def _round_up(x, m):
    return ((x + m - 1) // m) * m


# ------------------------------- Pallas kernel --------------------------------
def _ttm_matmul_kernel(x_ref, w_ref, o_ref, *, apply_act: bool, act_thres: float):
    # x_ref: (TB, k*K) packed activations (8 batch rows per 128-lane row)
    # w_ref: (k*K, k*O) block-diagonal packed effective TT weight (resident in VMEM)
    acc = jnp.dot(x_ref[...], w_ref[...], preferred_element_type=jnp.float32)
    if apply_act:
        acc = jnp.clip(acc, 0.0, act_thres)  # fused ReLUN(act_thres)
    o_ref[...] = acc.astype(o_ref.dtype)


# ----------------------- one-time (init) weight preparation --------------------
def build_full_weight(weights, in_shape, out_shape, tt_rank):
    """Contract TT cores into the dense (in_features, out_features) matrix W with y = x @ W."""
    order = len(in_shape)
    g0 = weights[0].reshape(tt_rank[0], out_shape[0], in_shape[0], tt_rank[1])
    T = g0.reshape(tt_rank[0] * out_shape[0], in_shape[0], tt_rank[1])  # (M, N, r), tt_rank[0]==1
    for i in range(1, order):
        gi = weights[i].reshape(tt_rank[i], out_shape[i], in_shape[i], tt_rank[i + 1])
        T = jnp.einsum("MNr,rmnq->MmNnq", T, gi)
        T = T.reshape(T.shape[0] * T.shape[1], T.shape[2] * T.shape[3], T.shape[4])
    W_mat = T.reshape(T.shape[0], T.shape[1])  # (out_features, in_features), tt_rank[-1]==1
    return W_mat.T                             # (in_features, out_features)


def _pack_factor(K, O, max_packed_width=2048):
    """Smallest k such that k*K and k*O are multiples of 128 lanes (1 if that gets too wide)."""
    kK = 128 // math.gcd(128, K)
    kO = 128 // math.gcd(128, O)
    k = kK * kO // math.gcd(kK, kO)
    if k * max(K, O) > max_packed_width:
        return 1
    return k


def precompute_packed_weight(weights, in_shape, out_shape, tt_rank):
    """Init-time prep: TT contraction + block-diagonal replication for lane-dense matmul."""
    K = math.prod(in_shape)
    O = math.prod(out_shape)
    w_full = build_full_weight(weights, in_shape, out_shape, tt_rank)  # (K, O)
    k = _pack_factor(K, O)
    if k == 1:
        return w_full, 1
    eye = jnp.eye(k, dtype=w_full.dtype)
    w_packed = eye[:, :, None, None] * w_full[None, None, :, :]        # (k, k, K, O)
    w_packed = jnp.transpose(w_packed, (0, 2, 1, 3)).reshape(k * K, k * O)
    return w_packed, k


# ------------------------------ forward (hot path) -----------------------------
def _row_tile(n_rows, row_bytes, target_rows=2048, max_block_bytes=4 << 20):
    """Packed-row tile: big enough to be bandwidth-bound, >=2 grid blocks when possible."""
    cap = max(8, (max_block_bytes // max(row_bytes, 1)) // 8 * 8)
    tile = min(target_rows, cap)
    if n_rows > 8:
        # prefer >= 2 grid blocks so v7x's two TensorCores both get work
        tile = min(tile, _round_up(-(-n_rows // 2), 8))
    return max(8, tile)


@functools.partial(jax.jit, static_argnames=("k", "act_thres", "apply_act"))
def ttm_linear_forward(x, w_packed, *, k, act_thres=6.0, apply_act=True):
    """y = ReLUN(x @ W_ttm): single fused pallas_call on the packed, lane-dense layout."""
    lead = x.shape[:-1]
    K_packed, O_packed = w_packed.shape
    K = K_packed // k
    O = O_packed // k
    B = int(np.prod(lead)) if lead else 1
    x2 = x.reshape(B, K)

    n_rows = -(-B // k)                                   # packed rows (k batch rows each)
    row_bytes = (K_packed + O_packed) * x2.dtype.itemsize
    tbp = _row_tile(n_rows, row_bytes)
    n_rows_p = _round_up(n_rows, tbp)
    Bp = n_rows_p * k
    if Bp != B:
        x2 = jnp.pad(x2, ((0, Bp - B), (0, 0)))           # single pad; zero rows -> zero outputs
    x_packed = x2.reshape(n_rows_p, K_packed)             # free reshape (row-major contiguous)

    grid = (n_rows_p // tbp,)
    y_packed = pl.pallas_call(
        functools.partial(_ttm_matmul_kernel, apply_act=apply_act, act_thres=float(act_thres)),
        out_shape=jax.ShapeDtypeStruct((n_rows_p, O_packed), x2.dtype),
        grid=grid,
        in_specs=[
            pl.BlockSpec((tbp, K_packed), lambda i: (i, 0)),       # lane-dense activation tile
            pl.BlockSpec((K_packed, O_packed), lambda i: (0, 0)),  # constant index_map -> resident
        ],
        out_specs=pl.BlockSpec((tbp, O_packed), lambda i: (i, 0)),  # unmasked 128-lane stores
        compiler_params=pltpu.CompilerParams(dimension_semantics=("parallel",)),
    )(x_packed, w_packed)

    y = y_packed.reshape(Bp, O)[:B]                       # free reshape + drop pad rows
    return y.reshape(lead + (O,))


# --------------------------------- reference -----------------------------------
def ttm_reference_forward(x, weights, in_shape, out_shape, tt_rank, act_thres=6.0):
    """Pure-JAX mirror of TTM_Linear_module.forward (fast_forward_flag=False, bias=None, ReLUN)."""
    order = len(in_shape)
    x_shape = x.shape
    output = x.reshape(x_shape[:-1] + tuple(in_shape))
    i_tp = -3
    for i in reversed(range(order)):
        temp_shape = output.shape[:-1]
        out2d = output.reshape((-1, output.shape[-1]))              # torch.flatten(0, -2)
        out2d = out2d @ weights[i].T                                # tt_cores[i] (linear, no bias)
        output = out2d.reshape(temp_shape + (out2d.shape[-1],))     # unflatten dim 0
        output = output.reshape(output.shape[:-1] + (tt_rank[i], out_shape[i]))
        if i > 0:
            output = jnp.swapaxes(output, -1, -2)
            output = jnp.swapaxes(output, -2, i_tp)
            output = output.reshape(output.shape[:-2] + (-1,))      # flatten(-2, -1)
            i_tp -= 1
        else:
            output = jnp.expand_dims(output, i_tp)
            output = jnp.swapaxes(output, -1, i_tp)
    output = output.reshape(x_shape[:-1] + (-1,))
    return jnp.clip(output, 0.0, act_thres)                         # ReLUN(act_thres)


# ------------------------------------ main --------------------------------------
if __name__ == "__main__":
    # Module config (TTM_Linear_module defaults).
    in_shape = (2, 2, 2, 2)
    out_shape = (2, 2, 2, 2)
    in_features = math.prod(in_shape)     # 16
    out_features = math.prod(out_shape)   # 16
    max_rank = 4
    order = len(in_shape)
    tt_rank = (1,) + (order - 1) * (max_rank,) + (1,)   # (1, 4, 4, 4, 1)
    act_thres = 6.0
    batch = 1000  # not a multiple of the pack factor -> exercises pad + tail slice; grid has 2 blocks

    # Deterministic TT-core weights (same init scale as reset_tt_cores).
    std = math.sqrt(5) / math.sqrt(in_features)
    r_prod = int(np.prod(tt_rank))
    std_factor = (std / r_prod) ** (1.0 / order)

    key = jax.random.PRNGKey(0)
    keys = jax.random.split(key, order + 1)
    weights = []
    for i in range(order):
        out_ch = tt_rank[i] * out_shape[i]
        in_ch = in_shape[i] * tt_rank[i + 1]
        w = jax.random.normal(keys[i], (out_ch, in_ch), dtype=jnp.float32) * std_factor
        weights.append(w)

    x = jax.random.normal(keys[order], (batch, in_features), dtype=jnp.float32)

    # One-time weight prep (layer constant), then a single fused pallas_call per forward.
    w_packed, pack_k = precompute_packed_weight(weights, in_shape, out_shape, tt_rank)
    w_packed = jax.block_until_ready(w_packed)

    out = ttm_linear_forward(x, w_packed, k=pack_k, act_thres=act_thres)
    out = jax.block_until_ready(out)

    ref = ttm_reference_forward(x, weights, in_shape, out_shape, tt_rank, act_thres)
    ref = jax.block_until_ready(ref)

    assert out.shape == (batch, out_features), out.shape
    np.testing.assert_allclose(np.asarray(out), np.asarray(ref), rtol=1e-4, atol=1e-5)

    print("KERNEL_OK")
</pallas_src>

<mosaic_0001>
module attributes {stable_mosaic.version = 11 : i64} {
  func.func @_ttm_matmul_kernel(%arg0: i32, %arg1: memref<64x128xf32, #tpu.memory_space<vmem>>, %arg2: memref<128x128xf32, #tpu.memory_space<vmem>>, %arg3: memref<64x128xf32, #tpu.memory_space<vmem>>) attributes {dimension_semantics = [#tpu.dimension_semantics<parallel>], iteration_bounds = array<i64: 2>, scalar_prefetch = 0 : i64, scratch_operands = 0 : i64, tpu.core_type = #tpu.core_type<tc>, window_params = [{transform_indices = @transform_0, window_bounds = array<i64: 64, 128>}, {pipeline_mode = #tpu.pipeline_mode<synchronous>, transform_indices = @transform_1, window_bounds = array<i64: 128, 128>}, {transform_indices = @transform_2, window_bounds = array<i64: 64, 128>}]} {
    %c0 = arith.constant 0 : index
    %c0_0 = arith.constant 0 : index
    %0 = vector.load %arg1[%c0, %c0_0] : memref<64x128xf32, #tpu.memory_space<vmem>>, vector<64x128xf32>
    %c0_1 = arith.constant 0 : index
    %c0_2 = arith.constant 0 : index
    %1 = vector.load %arg2[%c0_1, %c0_2] : memref<128x128xf32, #tpu.memory_space<vmem>>, vector<128x128xf32>
    %cst = arith.constant dense<0.000000e+00> : vector<64x128xf32>
    %2 = tpu.matmul %0, %1, %cst {dimension_numbers = #tpu.dot_dimension_numbers<[1], [0], [0], [1], [0, 0, 1, 1], [], []>} : vector<64x128xf32>, vector<128x128xf32>, vector<64x128xf32> -> vector<64x128xf32>
    %cst_3 = arith.constant 0.000000e+00 : f32
    %cst_4 = arith.constant 6.000000e+00 : f32
    %3 = vector.broadcast %cst_3 : f32 to vector<64x128xf32>
    %4 = arith.maximumf %3, %2 : vector<64x128xf32>
    %5 = vector.broadcast %cst_4 : f32 to vector<64x128xf32>
    %6 = arith.minimumf %5, %4 : vector<64x128xf32>
    %c0_5 = arith.constant 0 : index
    %c0_6 = arith.constant 0 : index
    %7 = vector.load %arg3[%c0_5, %c0_6] : memref<64x128xf32, #tpu.memory_space<vmem>>, vector<64x128xf32>
    tpu.vector_store %arg3[%c0_5, %c0_6], %6 {strides = array<i32>} : memref<64x128xf32, #tpu.memory_space<vmem>>, vector<64x128xf32>,
    return
  }
  func.func @transform_0(%arg0: i32) -> (i32, i32) {
    %c0_i32 = arith.constant 0 : i32
    %c0_i32_0 = arith.constant 0 : i32
    return %arg0, %c0_i32 : i32, i32
  }
  func.func @transform_1(%arg0: i32) -> (i32, i32) {
    %c0_i32 = arith.constant 0 : i32
    %c0_i32_0 = arith.constant 0 : i32
    %c0_i32_1 = arith.constant 0 : i32
    return %c0_i32, %c0_i32_0 : i32, i32
  }
  func.func @transform_2(%arg0: i32) -> (i32, i32) {
    %c0_i32 = arith.constant 0 : i32
    %c0_i32_0 = arith.constant 0 : i32
    return %arg0, %c0_i32 : i32, i32
  }
}

</mosaic_0001>

<bundles_post_ra>
// kernel: ttm_linear_forward.1
= control target key start
LH: loop header
LB: loop body
LE: loop exit
PB: predicated region body
PF: predicated region fallthrough
CT: control target
= control target key end

     0   :  { %s498_s9 = smov 0   ;;  %s572_s0 = inlined_call_operand.vmem [shape: f32[128,128], index: 0, kind: input, shape index: {}]   ;;  %s573_s1 = inlined_call_operand.vmem [shape: f32[128,128], index: 1, kind: input, shape index: {}]   ;;  %s574_s2 = inlined_call_operand.vmem [shape: f32[128,128], index: 2, kind: output, shape index: {}]  }
   0x1 LB: > { %s356_s10 = sadd.s32 4294967295, %s481_s9   ;;  %p360_p0 = scmp.ge.s32.totalorder %s481_s9, 1  ;;  %s481_s9 = sphi %s498_s9, %s12_s9  }
   0x2   : > { %p113_p1 = scmp.lt.s32.totalorder %s481_s9, 3 }
   0x4   : > { %p114_p2 = pnand %p360_p0, %p113_p1 }
   0x5   : > { %s361_s27 = sshll.u32 (!%p114_p2), %s356_s10, 3 }
   0x6   : > { %117 = sbr.rel (%p114_p2) target bundleno = 249 (0xf9), region = 28  ;;  %p136_p3 = scmp.lt.s32.totalorder (!%p114_p2), %s361_s27, 15 }
   0xb   : > { %v170_v0 = vld [vmem:[%s573_s1 + $0x78] sm:$0xff]  ;;  %v169_v1 = vld [vmem:[%s573_s1 + $0x70] sm:$0xff]  ;;  %v168_v2 = vld [vmem:[%s573_s1 + $0x68] sm:$0xff]  ;;  %s576_s27 = smov (!%p136_p3, %s361_s27), 15 }
   0xc   : > { %391 = vmatprep.subr.mxu0 %v170_v0  ;;  %435 = vmatprep.subr.mxu1 %v170_v0  ;;  %v167_v3 = vld [vmem:[%s573_s1 + $0x60] sm:$0xff]  ;;  %v166_v4 = vld [vmem:[%s573_s1 + $0x58] sm:$0xff]  ;;  %v165_v5 = vld [vmem:[%s573_s1 + $0x50] sm:$0xff]  ;;  %s362_s13 = sshll.u32 %s576_s27, 3 }
   0xd   : > { %392 = vmatpush3.msra.mxu0 %v170_v0  ;;  %451 = vmatpush3.msra.mxu1 %v170_v0  ;;  %v164_v6 = vld [vmem:[%s573_s1 + $0x48] sm:$0xff]  ;;  %v163_v7 = vld [vmem:[%s573_s1 + $0x40] sm:$0xff]  ;;  %v162_v8 = vld [vmem:[%s573_s1 + $0x38] sm:$0xff]  ;;  %s139_s18 = scalar_lea.vmem %s572_s0, %s362_s13  ;;  %s145_s23 = scalar_lea.vmem %s574_s2, %s362_s13 }
   0xe   : > { %393 = vmatprep.subr.mxu0 %v169_v1  ;;  %436 = vmatprep.subr.mxu1 %v169_v1  ;;  %v161_v9 = vld [vmem:[%s573_s1 + $0x30] sm:$0xff]  ;;  %v160_v10 = vld [vmem:[%s573_s1 + $0x28] sm:$0xff]  ;;  %v159_v11 = vld [vmem:[%s573_s1 + $0x20] sm:$0xff] }
   0xf   : > { %394 = vmatpush3.msra.mxu0 %v169_v1  ;;  %452 = vmatpush3.msra.mxu1 %v169_v1  ;;  %v158_v12 = vld [vmem:[%s573_s1 + $0x18] sm:$0xff]  ;;  %v157_v13 = vld [vmem:[%s573_s1 + $0x10] sm:$0xff]  ;;  %v156_v14 = vld [vmem:[%s573_s1 + $0x8] sm:$0xff] }
  0x10   : > { %395 = vmatprep.subr.mxu0 %v168_v2  ;;  %437 = vmatprep.subr.mxu1 %v168_v2  ;;  %v155_v15 = vld [vmem:[%s573_s1] sm:$0xff]  ;;  %v148_v18 = vld [vmem:[%s139_s18 + $0x8] sm:$0xff]  ;;  %v149_v20 = vld [vmem:[%s139_s18 + $0x10] sm:$0xff] }
  0x11   : > { %396 = vmatpush3.msra.mxu0 %v168_v2  ;;  %453 = vmatpush3.msra.mxu1 %v168_v2  ;;  %v147_v16 = vld [vmem:[%s139_s18] sm:$0xff]  ;;  %v152_v19 = vld [vmem:[%s139_s18 + $0x28] sm:$0xff]  ;;  %v153_v21 = vld [vmem:[%s139_s18 + $0x30] sm:$0xff] }
  0x12   : > { %397 = vmatprep.subr.mxu0 %v167_v3  ;;  %438 = vmatprep.subr.mxu1 %v167_v3  ;;  %v151_v17 = vld [vmem:[%s139_s18 + $0x20] sm:$0xff]  ;;  %v150_v22 = vld [vmem:[%s139_s18 + $0x18] sm:$0xff] }
  0x13   : > { %398 = vmatpush3.msra.mxu0 %v167_v3  ;;  %454 = vmatpush3.msra.mxu1 %v167_v3  ;;  %v154_v23 = vld [vmem:[%s139_s18 + $0x38] sm:$0xff] }
  0x14   : > { %399 = vmatprep.subr.mxu0 %v166_v4  ;;  %439 = vmatprep.subr.mxu1 %v166_v4 }
  0x15   : > { %400 = vmatpush3.msra.mxu0 %v166_v4  ;;  %455 = vmatpush3.msra.mxu1 %v166_v4 }
  0x16   : > { %401 = vmatprep.subr.mxu0 %v165_v5  ;;  %440 = vmatprep.subr.mxu1 %v165_v5 }
  0x17   : > { %402 = vmatpush3.msra.mxu0 %v165_v5  ;;  %456 = vmatpush3.msra.mxu1 %v165_v5 }
  0x18   : > { %403 = vmatprep.subr.mxu0 %v164_v6  ;;  %441 = vmatprep.subr.mxu1 %v164_v6 }
  0x19   : > { %404 = vmatpush3.msra.mxu0 %v164_v6  ;;  %457 = vmatpush3.msra.mxu1 %v164_v6 }
  0x1a   : > { %405 = vmatprep.subr.mxu0 %v163_v7  ;;  %442 = vmatprep.subr.mxu1 %v163_v7 }
  0x1b   : > { %406 = vmatpush3.msra.mxu0 %v163_v7  ;;  %458 = vmatpush3.msra.mxu1 %v163_v7 }
  0x1c   : > { %407 = vmatprep.subr.mxu0 %v162_v8  ;;  %443 = vmatprep.subr.mxu1 %v162_v8 }
  0x1d   : > { %408 = vmatpush3.msra.mxu0 %v162_v8  ;;  %459 = vmatpush3.msra.mxu1 %v162_v8 }
  0x1e   : > { %409 = vmatprep.subr.mxu0 %v161_v9  ;;  %444 = vmatprep.subr.mxu1 %v161_v9 }
  0x1f   : > { %410 = vmatpush3.msra.mxu0 %v161_v9  ;;  %460 = vmatpush3.msra.mxu1 %v161_v9 }
  0x20   : > { %411 = vmatprep.subr.mxu0 %v160_v10  ;;  %445 = vmatprep.subr.mxu1 %v160_v10 }
  0x21   : > { %412 = vmatpush3.msra.mxu0 %v160_v10  ;;  %461 = vmatpush3.msra.mxu1 %v160_v10 }
  0x22   : > { %413 = vmatprep.subr.mxu0 %v159_v11  ;;  %446 = vmatprep.subr.mxu1 %v159_v11 }
  0x23   : > { %414 = vmatpush3.msra.mxu0 %v159_v11  ;;  %462 = vmatpush3.msra.mxu1 %v159_v11 }
  0x24   : > { %415 = vmatprep.subr.mxu0 %v158_v12  ;;  %447 = vmatprep.subr.mxu1 %v158_v12 }
  0x25   : > { %416 = vmatpush3.msra.mxu0 %v158_v12  ;;  %463 = vmatpush3.msra.mxu1 %v158_v12 }
  0x26   : > { %417 = vmatprep.subr.mxu0 %v157_v13  ;;  %448 = vmatprep.subr.mxu1 %v157_v13 }
  0x27   : > { %418 = vmatpush3.msra.mxu0 %v157_v13  ;;  %464 = vmatpush3.msra.mxu1 %v157_v13 }
  0x28   : > { %419 = vmatprep.subr.mxu0 %v156_v14  ;;  %449 = vmatprep.subr.mxu1 %v156_v14 }
  0x29   : > { %420 = vmatpush3.msra.mxu0 %v156_v14  ;;  %465 = vmatpush3.msra.mxu1 %v156_v14 }
  0x2a   : > { %421 = vmatprep.subr.mxu0 %v155_v15  ;;  %450 = vmatprep.subr.mxu1 %v155_v15 }
  0x2b   : > { %422 = vmatpush3.msra.mxu0 %v155_v15  ;;  %466 = vmatpush3.msra.mxu1 %v155_v15 }
  0x2c   : > { %423 = vmatprep.mubr.f32.mxu0 %v147_v16  ;;  %429 = vmatprep.mubr.f32.mxu1 %v151_v17 }
  0x2d   : > { %424 = vmatmul.mubr.f32.vlgmr.msra.gmra.mxu0 %v148_v18  ;;  %430 = vmatmul.mubr.f32.vlgmr.msra.gmra.mxu1 %v152_v19 }
  0x2e   : > { %426 = vmatprep.mubr.f32.mxu0 %v149_v20  ;;  %432 = vmatprep.mubr.f32.mxu1 %v153_v21 }
  0x31   : > { %427 = vmatmul.mubr.f32.gmra.mxu0 %v150_v22  ;;  %433 = vmatmul.mubr.f32.gmra.mxu1 %v154_v23 }
  0xed   : > { %v425_v24 = vpop.f32.mrf.mxu0  ;;  %v431_v25 = vpop.f32.mrf.mxu1 }
  0xee   : > { %v277_v26 = vmax.f32 %v425_v24, 0.0  ;;  %v281_v27 = vmax.f32 %v431_v25, 0.0 }
  0xef   : > { %v237_v28 = vpop.f32.mrf.mxu0  ;;  %v257_v29 = vpop.f32.mrf.mxu1 }
  0xf0   : > { %v285_v30 = vmin.f32 %v277_v26, 6.0  ;;  %v289_v31 = vmin.f32 %v281_v27, 6.0  ;;  %v276_v32 = vmax.f32 %v237_v28, 0.0  ;;  %v280_v33 = vmax.f32 %v257_v29, 0.0 }
  0xf1   : > { %v428_v34 = vpop.f32.mrf.mxu0  ;;  %v434_v35 = vpop.f32.mrf.mxu1 }
  0xf2   : > { %293 = vst [vmem:[%s145_s23 + $0x8] sm:$0xff] %v285_v30  ;;  %297 = vst [vmem:[%s145_s23 + $0x28] sm:$0xff] %v289_v31  ;;  %v284_v36 = vmin.f32 %v276_v32, 6.0  ;;  %v288_v37 = vmin.f32 %v280_v33, 6.0  ;;  %v279_v38 = vmax.f32 %v428_v34, 0.0  ;;  %v283_v39 = vmax.f32 %v434_v35, 0.0 }
  0xf3   : > { %v247_v40 = vpop.f32.mrf.mxu0  ;;  %v267_v41 = vpop.f32.mrf.mxu1 }
  0xf4   : > { %292 = vst [vmem:[%s145_s23] sm:$0xff] %v284_v36  ;;  %296 = vst [vmem:[%s145_s23 + $0x20] sm:$0xff] %v288_v37  ;;  %v287_v42 = vmin.f32 %v279_v38, 6.0  ;;  %v291_v43 = vmin.f32 %v283_v39, 6.0  ;;  %v278_v44 = vmax.f32 %v247_v40, 0.0  ;;  %v282_v45 = vmax.f32 %v267_v41, 0.0 }
  0xf6   : > { %295 = vst [vmem:[%s145_s23 + $0x18] sm:$0xff] %v287_v42  ;;  %299 = vst [vmem:[%s145_s23 + $0x38] sm:$0xff] %v291_v43  ;;  %v286_v46 = vmin.f32 %v278_v44, 6.0  ;;  %v290_v47 = vmin.f32 %v282_v45, 6.0 }
  0xf8   : > { %294 = vst [vmem:[%s145_s23 + $0x10] sm:$0xff] %v286_v46  ;;  %298 = vst [vmem:[%s145_s23 + $0x30] sm:$0xff] %v290_v47 }
  0xf9 PF: > { %s12_s9 = sadd.s32 1, %s481_s9  }
  0xfa   : > { %p9_p4 = scmp.ge.s32.totalorder %s12_s9, 4  }
  0xfc   :  { %11 = sbr.rel (!%p9_p4) target bundleno = 1 (0x1), region = 58 }

</bundles_post_ra>
